<compile_context>
chip_gen: v6e
topology: v6e:2x2x1
jax: 0.10.0
libtpu: 0.0.40
codegen_flags: <defaults>
</compile_context>

<pallas_src>
import functools

import jax
import jax.numpy as jnp
from jax.experimental import pallas as pl
from jax.experimental.pallas import tpu as pltpu


def _round_up(x, m):
    return ((x + m - 1) // m) * m


def _cdiv(a, b):
    return (a + b - 1) // b


def single_option_vol_kernel(x_ref, col_ref, w_ref, out_ref, *, dims):
    """Fused forward pass for one batch tile.

    x_ref:   (2, TB)        row 0 = moneyness, row 1 = tau, batch on lanes
    col_ref: (Ncol, 1)      packed column slab (rank-1 weights + all biases)
    w_ref:   (Nw, Wmax)     packed weight slab (row-stacked, lane-padded)
    out_ref: (1, TB)
    """
    H0, H1, H2, H3, H4 = dims
    f32 = jnp.float32

    x = x_ref[...]                                   # (2, TB)
    xm = x[0:1, :]                                   # (1, TB) moneyness
    xt = x[1:2, :]                                   # (1, TB) tau

    # ---- static slices of the packed column slab -------------------------
    col = col_ref[...]                               # (Ncol, 1)
    o = 0
    w0m = col[o:o + 2 * H0]; o += 2 * H0             # rank-1 weight for xm
    w0t = col[o:o + 2 * H0]; o += 2 * H0             # rank-1 weight for xt
    b0 = col[o:o + 2 * H0]; o += 2 * H0
    b1 = col[o:o + 2 * H1]; o += 2 * H1
    b2 = col[o:o + H2]; o += H2
    b3 = col[o:o + H3]; o += H3
    b4 = col[o:o + H4]; o += H4

    # ---- static slices of the packed weight slab --------------------------
    w = w_ref[...]                                   # (Nw, Wmax)
    r = 0
    w1 = w[r:r + 2 * H1, :2 * H0]; r += 2 * H1       # block-diag mh/th (scale folded)
    w2 = w[r:r + H2, :H1]; r += H2                   # new_hidden
    w3 = w[r:r + H3, :H2]; r += H3                   # new_hidden2
    w4 = w[r:r + H4, :H3]; r += H4                   # new_hidden3
    w5 = w[r:r + 1, :H4]                             # exp(last_idden3)^T

    # Stacked rank-1 input layer.  tanh is evaluated via 2*sigmoid(2z)-1 with
    # the *2 pre-scaling baked into w0m/b0 and the 2*s-1 post scale/offset
    # folded into w1/b1 during prepare_params -> one EUP pass, no concat.
    # TODO(synk): SmileTanh is not defined in the reference source; using tanh.
    sig = jax.nn.sigmoid(w0m * xm + w0t * xt + b0)   # (2*H0, TB)

    # Fused mh/th branches: one block-diagonal matmul, then relu + gate.
    z = jnp.maximum(
        jnp.dot(w1, sig, preferred_element_type=f32) + b1, 0.0)   # (2*H1, TB)
    tm = z[:H1, :] * z[H1:, :]                                     # (H1, TB)

    # etm = relu(new_hidden3(relu(new_hidden2(relu(new_hidden(tm))))))
    h = jnp.maximum(jnp.dot(w2, tm, preferred_element_type=f32) + b2, 0.0)
    h = jnp.maximum(jnp.dot(w3, h, preferred_element_type=f32) + b3, 0.0)
    h = jnp.maximum(jnp.dot(w4, h, preferred_element_type=f32) + b4, 0.0)

    # res = etm @ exp(last_idden3) -> (1, TB) lane-dense output tile on the MXU.
    out_ref[...] = jnp.dot(
        w5, h, preferred_element_type=f32).astype(out_ref.dtype)


def prepare_params(params):
    """One-time weight preprocessing (hoisted out of the per-call path).

    Folds:  tanh -> sigmoid identity (scale/offset into the mh/th matmul),
            mh/th -> one block-diagonal matmul, exp(last_idden3) -> row vector,
    and packs everything into two contiguous f32 slabs.
    """
    f32 = jnp.float32
    (w_smile, b_smile, w_act, b_act, w_mh, b_mh, w_th, b_th,
     w_nh, b_nh, w_nh2, b_nh2, w_nh3, b_nh3, w_last) = [
        jnp.asarray(p, f32) for p in params]

    H0 = w_smile.shape[0]
    H1 = w_mh.shape[0]
    H2 = w_nh.shape[0]
    H3 = w_nh2.shape[0]
    H4 = w_nh3.shape[0]

    zeros_h0 = jnp.zeros((H0, 1), f32)
    # Rank-1 input layer, stacked [smile; act], with the *2 of the tanh identity
    # applied to the smile half.
    w0m = jnp.concatenate([2.0 * w_smile.reshape(H0, 1), zeros_h0], axis=0)
    w0t = jnp.concatenate([zeros_h0, w_act.reshape(H0, 1)], axis=0)
    b0 = jnp.concatenate([2.0 * b_smile.reshape(H0, 1),
                          b_act.reshape(H0, 1)], axis=0)

    # Block-diagonal mh/th matmul with the tanh post scale (2) / offset (-1)
    # folded in:  w1' = [[2*w_mh, 0], [0, w_th]],  b1' = [b_mh - w_mh@1; b_th].
    w1 = jnp.zeros((2 * H1, 2 * H0), f32)
    w1 = w1.at[:H1, :H0].set(2.0 * w_mh).at[H1:, H0:].set(w_th)
    b1 = jnp.concatenate([(b_mh - w_mh.sum(axis=1)).reshape(H1, 1),
                          b_th.reshape(H1, 1)], axis=0)

    b2 = b_nh.reshape(H2, 1)
    b3 = b_nh2.reshape(H3, 1)
    b4 = b_nh3.reshape(H4, 1)
    w5 = jnp.exp(w_last).reshape(H4, 1).T                  # (1, H4)

    col_slab = jnp.concatenate([w0m, w0t, b0, b1, b2, b3, b4], axis=0)  # (Ncol,1)

    wmax = max(2 * H0, H1, H2, H3, H4)

    def padw(m):
        return jnp.pad(m, ((0, 0), (0, wmax - m.shape[1])))

    w_slab = jnp.concatenate(
        [padw(w1), padw(w_nh), padw(w_nh2), padw(w_nh3), padw(w5)], axis=0)

    return {
        "col_slab": col_slab,                       # (3*2H0 + 2H1 + H2+H3+H4, 1)
        "w_slab": w_slab,                           # (2H1 + H2+H3+H4 + 1, wmax)
        "dims": (H0, H1, H2, H3, H4),               # static python ints
    }


def single_option_volatility(inp, prepared, *, tile_b=2048):
    """inp: (B, 1, 2) float32.  prepared: output of prepare_params()."""
    f32 = jnp.float32
    col_slab = prepared["col_slab"]
    w_slab = prepared["w_slab"]
    dims = prepared["dims"]
    H0, H1, H2, H3, H4 = dims

    B = inp.shape[0]

    # ---- tiling -----------------------------------------------------------
    tile_b = _round_up(max(128, int(tile_b)), 128)
    b128 = _round_up(B, 128)
    tile_b = min(tile_b, b128)                       # don't over-pad tiny batches
    if B >= 256:
        # Guarantee >= 2 grid steps so the "parallel" batch axis can be sharded
        # across both TensorCores on v7x (no-op on single-TC v5e/v6e).
        tile_b = min(tile_b, _round_up(_cdiv(B, 2), 128))
    b_pad = _round_up(B, tile_b)
    grid = (b_pad // tile_b,)

    # ---- batch-on-lanes input relayout: (2, B_pad) --------------------------
    x2 = inp[:, 0, :].astype(f32).T                  # (2, B): row0=moneyness, row1=tau
    if b_pad != B:
        x2 = jnp.pad(x2, ((0, 0), (0, b_pad - B)))   # zero lanes stay finite

    # ---- cost hint for the XLA scheduler ------------------------------------
    flops_per_elem = (2 * (2 * H1) * (2 * H0) + 2 * H2 * H1 + 2 * H3 * H2 +
                      2 * H4 * H3 + 2 * H4 + 5 * 2 * H0)
    cost = pl.CostEstimate(
        flops=int(flops_per_elem) * int(b_pad),
        transcendentals=2 * H0 * int(b_pad),
        bytes_accessed=12 * int(b_pad) + 4 * int(col_slab.size + w_slab.size))

    kernel = functools.partial(single_option_vol_kernel, dims=dims)

    out = pl.pallas_call(
        kernel,
        out_shape=jax.ShapeDtypeStruct((1, b_pad), f32),
        grid=grid,
        in_specs=[
            pl.BlockSpec((2, tile_b), lambda i: (0, i)),          # inputs (tiled)
            pl.BlockSpec(col_slab.shape, lambda i: (0, 0)),       # column slab (resident)
            pl.BlockSpec(w_slab.shape, lambda i: (0, 0)),         # weight slab (resident)
        ],
        out_specs=pl.BlockSpec((1, tile_b), lambda i: (0, i)),
        compiler_params=pltpu.CompilerParams(
            dimension_semantics=("parallel",)),      # shard batch across TCs on v7x
        cost_estimate=cost,
    )(x2, col_slab, w_slab)

    return out[0, :B].reshape(B, 1)


def _reference(inp, params):
    (w_smile, b_smile, w_act, b_act, w_mh, b_mh, w_th, b_th,
     w_nh, b_nh, w_nh2, b_nh2, w_nh3, b_nh3, w_last) = params
    x_m = inp[:, :, 0]                               # (B, 1)
    x_t = inp[:, :, 1]                               # (B, 1)
    m = jnp.tanh(x_m @ w_smile.T + b_smile)
    tau = jax.nn.sigmoid(x_t @ w_act.T + b_act)
    m = jax.nn.relu(m @ w_mh.T + b_mh)
    tau = jax.nn.relu(tau @ w_th.T + b_th)
    tm = m * tau
    h = jax.nn.relu(tm @ w_nh.T + b_nh)
    h = jax.nn.relu(h @ w_nh2.T + b_nh2)
    h = jax.nn.relu(h @ w_nh3.T + b_nh3)
    return h @ jnp.exp(w_last)


if __name__ == "__main__":
    key = jax.random.PRNGKey(0)
    hidden = [32, 32, 32, 32, 32]                    # hidden_size_list

    def linear_params(k, fan_in, fan_out):
        kw, kb = jax.random.split(k)
        w = jax.random.normal(kw, (fan_out, fan_in), jnp.float32) * 0.1   # (out, in)
        b = jax.random.normal(kb, (fan_out,), jnp.float32) * 0.1
        return w, b

    ks = jax.random.split(key, 9)
    w_smile, b_smile = linear_params(ks[0], 1, hidden[0])
    w_act, b_act = linear_params(ks[1], 1, hidden[0])
    w_mh, b_mh = linear_params(ks[2], hidden[0], hidden[1])
    w_th, b_th = linear_params(ks[3], hidden[0], hidden[1])
    w_nh, b_nh = linear_params(ks[4], hidden[1], hidden[2])
    w_nh2, b_nh2 = linear_params(ks[5], hidden[2], hidden[3])
    w_nh3, b_nh3 = linear_params(ks[6], hidden[3], hidden[4])
    w_last = jax.random.normal(ks[7], (hidden[4], 1), jnp.float32)        # last_idden3

    params = [w_smile, b_smile, w_act, b_act, w_mh, b_mh, w_th, b_th,
              w_nh, b_nh, w_nh2, b_nh2, w_nh3, b_nh3, w_last]

    # One-time weight preprocessing / packing (hoisted out of the call path).
    prepared = jax.tree_util.tree_map(jax.block_until_ready,
                                      prepare_params(params))

    # Small single-tile case, a multi-tile case with a ragged tail (B=300 ->
    # two tiles of 256), and a mid-size case that exercises the >=2-step split.
    for B, tile_b in [(8, 2048), (300, 2048), (1024, 512)]:
        inp = jax.random.normal(jax.random.fold_in(ks[8], B), (B, 1, 2), jnp.float32)
        out = jax.block_until_ready(
            single_option_volatility(inp, prepared, tile_b=tile_b))
        ref = jax.block_until_ready(_reference(inp, params))
        assert out.shape == (B, 1)
        err = float(jnp.max(jnp.abs(out - ref)))
        assert jnp.allclose(out, ref, atol=1e-3, rtol=1e-3), (B, err)

    print("KERNEL_OK")
</pallas_src>

<mosaic_0001>
module attributes {stable_mosaic.version = 11 : i64} {
  func.func @single_option_vol_kernel(%arg0: i32, %arg1: memref<2x128xf32, #tpu.memory_space<vmem>>, %arg2: memref<352x1xf32, #tpu.memory_space<vmem>>, %arg3: memref<161x64xf32, #tpu.memory_space<vmem>>, %arg4: memref<1x128xf32, #tpu.memory_space<vmem>>) attributes {dimension_semantics = [#tpu.dimension_semantics<parallel>], iteration_bounds = array<i64: 1>, scalar_prefetch = 0 : i64, scratch_operands = 0 : i64, tpu.core_type = #tpu.core_type<tc>, window_params = [{transform_indices = @transform_0, window_bounds = array<i64: 2, 128>}, {pipeline_mode = #tpu.pipeline_mode<synchronous>, transform_indices = @transform_1, window_bounds = array<i64: 352, 1>}, {pipeline_mode = #tpu.pipeline_mode<synchronous>, transform_indices = @transform_2, window_bounds = array<i64: 161, 64>}, {transform_indices = @transform_3, window_bounds = array<i64: 1, 128>}]} {
    %c0 = arith.constant 0 : index
    %c0_0 = arith.constant 0 : index
    %0 = vector.load %arg1[%c0, %c0_0] : memref<2x128xf32, #tpu.memory_space<vmem>>, vector<2x128xf32>
    %1 = vector.extract_strided_slice %0 {offsets = [0, 0], sizes = [1, 128], strides = [1, 1]} : vector<2x128xf32> to vector<1x128xf32>
    %2 = vector.extract_strided_slice %0 {offsets = [1, 0], sizes = [1, 128], strides = [1, 1]} : vector<2x128xf32> to vector<1x128xf32>
    %c0_1 = arith.constant 0 : index
    %c0_2 = arith.constant 0 : index
    %3 = vector.load %arg2[%c0_1, %c0_2] : memref<352x1xf32, #tpu.memory_space<vmem>>, vector<352x1xf32>
    %4 = vector.extract_strided_slice %3 {offsets = [0, 0], sizes = [64, 1], strides = [1, 1]} : vector<352x1xf32> to vector<64x1xf32>
    %5 = vector.extract_strided_slice %3 {offsets = [64, 0], sizes = [64, 1], strides = [1, 1]} : vector<352x1xf32> to vector<64x1xf32>
    %6 = vector.extract_strided_slice %3 {offsets = [128, 0], sizes = [64, 1], strides = [1, 1]} : vector<352x1xf32> to vector<64x1xf32>
    %7 = vector.extract_strided_slice %3 {offsets = [192, 0], sizes = [64, 1], strides = [1, 1]} : vector<352x1xf32> to vector<64x1xf32>
    %8 = vector.extract_strided_slice %3 {offsets = [256, 0], sizes = [32, 1], strides = [1, 1]} : vector<352x1xf32> to vector<32x1xf32>
    %9 = vector.extract_strided_slice %3 {offsets = [288, 0], sizes = [32, 1], strides = [1, 1]} : vector<352x1xf32> to vector<32x1xf32>
    %10 = vector.extract_strided_slice %3 {offsets = [320, 0], sizes = [32, 1], strides = [1, 1]} : vector<352x1xf32> to vector<32x1xf32>
    %c0_3 = arith.constant 0 : index
    %c0_4 = arith.constant 0 : index
    %11 = vector.load %arg3[%c0_3, %c0_4] : memref<161x64xf32, #tpu.memory_space<vmem>>, vector<161x64xf32>
    %12 = vector.extract_strided_slice %11 {offsets = [0, 0], sizes = [64, 64], strides = [1, 1]} : vector<161x64xf32> to vector<64x64xf32>
    %13 = vector.extract_strided_slice %11 {offsets = [64, 0], sizes = [32, 32], strides = [1, 1]} : vector<161x64xf32> to vector<32x32xf32>
    %14 = vector.extract_strided_slice %11 {offsets = [96, 0], sizes = [32, 32], strides = [1, 1]} : vector<161x64xf32> to vector<32x32xf32>
    %15 = vector.extract_strided_slice %11 {offsets = [128, 0], sizes = [32, 32], strides = [1, 1]} : vector<161x64xf32> to vector<32x32xf32>
    %16 = vector.extract_strided_slice %11 {offsets = [160, 0], sizes = [1, 32], strides = [1, 1]} : vector<161x64xf32> to vector<1x32xf32>
    %17 = vector.broadcast %4 : vector<64x1xf32> to vector<64x128xf32>
    %18 = vector.broadcast %1 : vector<1x128xf32> to vector<64x128xf32>
    %19 = arith.mulf %17, %18 : vector<64x128xf32>
    %20 = vector.broadcast %5 : vector<64x1xf32> to vector<64x128xf32>
    %21 = vector.broadcast %2 : vector<1x128xf32> to vector<64x128xf32>
    %22 = arith.mulf %20, %21 : vector<64x128xf32>
    %23 = arith.addf %19, %22 : vector<64x128xf32>
    %24 = vector.broadcast %6 : vector<64x1xf32> to vector<64x128xf32>
    %25 = arith.addf %23, %24 : vector<64x128xf32>
    %26 = arith.negf %25 : vector<64x128xf32>
    %27 = math.exp %26 : vector<64x128xf32>
    %cst = arith.constant 1.000000e+00 : f32
    %28 = vector.broadcast %cst : f32 to vector<64x128xf32>
    %29 = arith.addf %28, %27 : vector<64x128xf32>
    %30 = arith.divf %28, %29 : vector<64x128xf32>
    %cst_5 = arith.constant dense<0.000000e+00> : vector<64x128xf32>
    %31 = tpu.matmul %12, %30, %cst_5 {dimension_numbers = #tpu.dot_dimension_numbers<[1], [0], [0], [1], [0, 0, 1, 1], [], []>} : vector<64x64xf32>, vector<64x128xf32>, vector<64x128xf32> -> vector<64x128xf32>
    %32 = vector.broadcast %7 : vector<64x1xf32> to vector<64x128xf32>
    %33 = arith.addf %31, %32 : vector<64x128xf32>
    %cst_6 = arith.constant 0.000000e+00 : f32
    %34 = vector.broadcast %cst_6 : f32 to vector<64x128xf32>
    %35 = arith.maximumf %33, %34 : vector<64x128xf32>
    %36 = vector.extract_strided_slice %35 {offsets = [0, 0], sizes = [32, 128], strides = [1, 1]} : vector<64x128xf32> to vector<32x128xf32>
    %37 = vector.extract_strided_slice %35 {offsets = [32, 0], sizes = [32, 128], strides = [1, 1]} : vector<64x128xf32> to vector<32x128xf32>
    %38 = arith.mulf %36, %37 : vector<32x128xf32>
    %cst_7 = arith.constant dense<0.000000e+00> : vector<32x128xf32>
    %39 = tpu.matmul %13, %38, %cst_7 {dimension_numbers = #tpu.dot_dimension_numbers<[1], [0], [0], [1], [0, 0, 1, 1], [], []>} : vector<32x32xf32>, vector<32x128xf32>, vector<32x128xf32> -> vector<32x128xf32>
    %40 = vector.broadcast %8 : vector<32x1xf32> to vector<32x128xf32>
    %41 = arith.addf %39, %40 : vector<32x128xf32>
    %cst_8 = arith.constant 0.000000e+00 : f32
    %42 = vector.broadcast %cst_8 : f32 to vector<32x128xf32>
    %43 = arith.maximumf %41, %42 : vector<32x128xf32>
    %cst_9 = arith.constant dense<0.000000e+00> : vector<32x128xf32>
    %44 = tpu.matmul %14, %43, %cst_9 {dimension_numbers = #tpu.dot_dimension_numbers<[1], [0], [0], [1], [0, 0, 1, 1], [], []>} : vector<32x32xf32>, vector<32x128xf32>, vector<32x128xf32> -> vector<32x128xf32>
    %45 = vector.broadcast %9 : vector<32x1xf32> to vector<32x128xf32>
    %46 = arith.addf %44, %45 : vector<32x128xf32>
    %cst_10 = arith.constant 0.000000e+00 : f32
    %47 = vector.broadcast %cst_10 : f32 to vector<32x128xf32>
    %48 = arith.maximumf %46, %47 : vector<32x128xf32>
    %cst_11 = arith.constant dense<0.000000e+00> : vector<32x128xf32>
    %49 = tpu.matmul %15, %48, %cst_11 {dimension_numbers = #tpu.dot_dimension_numbers<[1], [0], [0], [1], [0, 0, 1, 1], [], []>} : vector<32x32xf32>, vector<32x128xf32>, vector<32x128xf32> -> vector<32x128xf32>
    %50 = vector.broadcast %10 : vector<32x1xf32> to vector<32x128xf32>
    %51 = arith.addf %49, %50 : vector<32x128xf32>
    %cst_12 = arith.constant 0.000000e+00 : f32
    %52 = vector.broadcast %cst_12 : f32 to vector<32x128xf32>
    %53 = arith.maximumf %51, %52 : vector<32x128xf32>
    %cst_13 = arith.constant dense<0.000000e+00> : vector<1x128xf32>
    %54 = tpu.matmul %16, %53, %cst_13 {dimension_numbers = #tpu.dot_dimension_numbers<[1], [0], [0], [1], [0, 0, 1, 1], [], []>} : vector<1x32xf32>, vector<32x128xf32>, vector<1x128xf32> -> vector<1x128xf32>
    %c0_14 = arith.constant 0 : index
    %c0_15 = arith.constant 0 : index
    %55 = vector.load %arg4[%c0_14, %c0_15] : memref<1x128xf32, #tpu.memory_space<vmem>>, vector<1x128xf32>
    tpu.vector_store %arg4[%c0_14, %c0_15], %54 {strides = array<i32>} : memref<1x128xf32, #tpu.memory_space<vmem>>, vector<1x128xf32>,
    return
  }
  func.func @transform_0(%arg0: i32) -> (i32, i32) {
    %c0_i32 = arith.constant 0 : i32
    %c0_i32_0 = arith.constant 0 : i32
    return %c0_i32, %arg0 : i32, i32
  }
  func.func @transform_1(%arg0: i32) -> (i32, i32) {
    %c0_i32 = arith.constant 0 : i32
    %c0_i32_0 = arith.constant 0 : i32
    %c0_i32_1 = arith.constant 0 : i32
    return %c0_i32, %c0_i32_0 : i32, i32
  }
  func.func @transform_2(%arg0: i32) -> (i32, i32) {
    %c0_i32 = arith.constant 0 : i32
    %c0_i32_0 = arith.constant 0 : i32
    %c0_i32_1 = arith.constant 0 : i32
    return %c0_i32, %c0_i32_0 : i32, i32
  }
  func.func @transform_3(%arg0: i32) -> (i32, i32) {
    %c0_i32 = arith.constant 0 : i32
    %c0_i32_0 = arith.constant 0 : i32
    return %c0_i32, %arg0 : i32, i32
  }
}

</mosaic_0001>

<bundles_post_ra>
// kernel: tpu_custom_call.1
= control target key start
LH: loop header
LB: loop body
LE: loop exit
PB: predicated region body
PF: predicated region fallthrough
CT: control target
= control target key end

     0   :  { %v1138_v2 = vmov 0   ;;  %s1394_s0 = inlined_call_operand.vmem [shape: f32[2,128], index: 0, kind: input, shape index: {}]   ;;  %s1395_s1 = inlined_call_operand.vmem [shape: f32[352,1], index: 1, kind: input, shape index: {}]   ;;  %s1396_s2 = inlined_call_operand.vmem [shape: f32[161,64], index: 2, kind: input, shape index: {}]   ;;  %s1397_s3 = inlined_call_operand.hbm [shape: f32[1,128], index: 3, kind: output, shape index: {}]  }
   0x1   :  { %v23_v0 = vld [vmem:[%s1395_s1 + $0x38] sm:$0xff]  ;;  %v22_v1 = vld [vmem:[%s1395_s1 + $0x30] sm:$0xff]  ;;  %1083 = vset.pattern.permute.xlu1 %v1138_v2  ;;  %1082 = vset.pattern.permute.xlu0 %v1138_v2  ;;  %v29_v5 = vld [vmem:[%s1395_s1 + $0x68] sm:$0xff] }
   0x2   :  { %118 = vperm.xlu0 %1082, %v23_v0   ;;  %113 = vperm.xlu1 %1083, %v22_v1   ;;  %v31_v3 = vld [vmem:[%s1395_s1 + $0x78] sm:$0xff]  ;;  %v30_v4 = vld [vmem:[%s1395_s1 + $0x70] sm:$0xff]  ;;  %v21_v6 = vld [vmem:[%s1395_s1 + $0x28] sm:$0xff] }
   0x3   :  { %v39_v7 = vld [vmem:[%s1395_s1 + $0xb8] sm:$0xff]  ;;  %v20_v8 = vld [vmem:[%s1395_s1 + $0x20] sm:$0xff]  ;;  %v38_v10 = vld [vmem:[%s1395_s1 + $0xb0] sm:$0xff] }
   0x4   :  { %v28_v9 = vld [vmem:[%s1395_s1 + $0x60] sm:$0xff] }
   0x6   :  { %170 = vperm.xlu0 %1082, %v31_v3   ;;  %165 = vperm.xlu1 %1083, %v30_v4  }
   0xa   :  { %160 = vperm.xlu1 %1083, %v29_v5   ;;  %108 = vperm.xlu0 %1082, %v21_v6  }
   0xe   :  { %230 = vperm.xlu0 %1082, %v39_v7   ;;  %103 = vperm.xlu1 %1083, %v20_v8  }
   0xf   :  { %8 = vsyncpa [#allocation3], 0  ;;  %v27_v11 = vld [vmem:[%s1395_s1 + $0x58] sm:$0xff]  ;;  %v37_v13 = vld [vmem:[%s1395_s1 + $0xa8] sm:$0xff]  ;;  %vm329_vm0 = vcmask 523264   ;;  %v121_v46 = vlaneseq  ;;  %vm491_vm1 = vcmask 261120  }
  0x10   :  { %v19_v12 = vld [vmem:[%s1395_s1 + $0x18] sm:$0xff]  ;;  %v18_v14 = vld [vmem:[%s1395_s1 + $0x10] sm:$0xff]  ;;  %v36_v16 = vld [vmem:[%s1395_s1 + $0xa0] sm:$0xff]  ;;  %vm1140_vm2 = vmmov 0   ;;  %s1141_s5 = smov [#allocation2]  }
  0x11   :  { %v26_v15 = vld [vmem:[%s1395_s1 + $0x50] sm:$0xff]  ;;  %v25_v17 = vld [vmem:[%s1395_s1 + $0x48] sm:$0xff]  ;;  %v35_v19 = vld [vmem:[%s1395_s1 + $0x98] sm:$0xff]  ;;  %v122_v47 = vshrl.u32 %v121_v46, 7  ;;  %s915_s6 = sshll.u32 %s1141_s5, 4  ;;  %s916_s6 = int_to_ptr.vmem [resolvable:$true] %s915_s6 }
  0x12   :  { %155 = vperm.xlu0 %1082, %v28_v9   ;;  %225 = vperm.xlu1 %1083, %v38_v10   ;;  %v17_v18 = vld [vmem:[%s1395_s1 + $0x8] sm:$0xff]  ;;  %v16_v20 = vld [vmem:[%s1395_s1] sm:$0xff]  ;;  %v34_v22 = vld [vmem:[%s1395_s1 + $0x90] sm:$0xff]  ;;  %s1116_s7 = scalar_lea.vmem %s916_s6, 16  ;;  %s1120_s8 = scalar_lea.vmem %s916_s6, 32 }
  0x13   :  { %v24_v21 = vld [vmem:[%s1395_s1 + $0x40] sm:$0xff]  ;;  %v33_v23 = vld [vmem:[%s1395_s1 + $0x88] sm:$0xff]  ;;  %v43_v25 = vld [vmem:[%s1395_s1 + $0xd8] sm:$0xff]  ;;  %v175_v48 = vsub.s32 1, %v122_v47  ;;  %v123_v51 = vsub.s32 0, %v122_v47  ;;  %p1117_p0 = scmp.ne.s32.totalorder %s916_s6, %s1116_s7  ;;  %p1121_p1 = scmp.lt.s32.totalorder %s916_s6, %s916_s6 }
  0x14   :  { %v32_v24 = vld [vmem:[%s1395_s1 + $0x80] sm:$0xff]  ;;  %v47_v26 = vld [vmem:[%s1395_s1 + $0xf8] sm:$0xff]  ;;  %v42_v27 = vld [vmem:[%s1395_s1 + $0xd0] sm:$0xff]  ;;  %p1122_p2 = scmp.lt.s32.totalorder %s1120_s8, %s1116_s7 }
  0x15   :  { %v46_v28 = vld [vmem:[%s1395_s1 + $0xf0] sm:$0xff]  ;;  %v41_v29 = vld [vmem:[%s1395_s1 + $0xc8] sm:$0xff]  ;;  %v40_v31 = vld [vmem:[%s1395_s1 + $0xc0] sm:$0xff] }
  0x16   :  { %150 = vperm.xlu1 %1083, %v27_v11   ;;  %98 = vperm.xlu0 %1082, %v19_v12   ;;  %v45_v30 = vld [vmem:[%s1395_s1 + $0xe8] sm:$0xff]  ;;  %v44_v32 = vld [vmem:[%s1395_s1 + $0xe0] sm:$0xff]  ;;  %v51_v33 = vld [vmem:[%s1395_s1 + $0x118] sm:$0xff]  ;;  %p1123_p3 = por %p1122_p2, %p1121_p1 }
  0x17   :  { %v50_v34 = vld [vmem:[%s1395_s1 + $0x110] sm:$0xff]  ;;  %v49_v35 = vld [vmem:[%s1395_s1 + $0x108] sm:$0xff]  ;;  %v48_v36 = vld [vmem:[%s1395_s1 + $0x100] sm:$0xff] }
  0x18   :  { %v55_v37 = vld [vmem:[%s1395_s1 + $0x138] sm:$0xff]  ;;  %v54_v38 = vld [vmem:[%s1395_s1 + $0x130] sm:$0xff]  ;;  %v53_v39 = vld [vmem:[%s1395_s1 + $0x128] sm:$0xff]  ;;  %p1124_p4 = pnand %p1123_p3, %p1117_p0 }
  0x19   :  { %v52_v40 = vld [vmem:[%s1395_s1 + $0x120] sm:$0xff]  ;;  %v59_v41 = vld [vmem:[%s1395_s1 + $0x158] sm:$0xff]  ;;  %v58_v42 = vld [vmem:[%s1395_s1 + $0x150] sm:$0xff] }
  0x1a   :  { %220 = vperm.xlu0 %1082, %v37_v13   ;;  %93 = vperm.xlu1 %1083, %v18_v14   ;;  %v60_v43 = vld [vmem:[%s1396_s2] sm:$0xff]  ;;  %v57_v44 = vld [vmem:[%s1395_s1 + $0x148] sm:$0xff] }
  0x1b   :  { %1013 = vmatprep.mubr.msk.f32.mxu0 %vm329_vm0, %v60_v43  ;;  %v56_v45 = vld [vmem:[%s1395_s1 + $0x140] sm:$0xff] }
  0x1c   :  { %v15_v52 = vld [vmem:[%s1394_s0] sm:$0x3] }
  0x1d   :  { %v1301_v53 = vrot.slane %v15_v52, %v175_v48  ;;  %v124_v56 = vrot.slane %v15_v52, %v123_v51 }
  0x1e   :  { %145 = vperm.xlu0 %1082, %v26_v15   ;;  %215 = vperm.xlu1 %1083, %v36_v16  }
  0x22   :  { %140 = vperm.xlu1 %1083, %v25_v17   ;;  %88 = vperm.xlu0 %1082, %v17_v18  }
  0x26   :  { %210 = vperm.xlu0 %1082, %v35_v19   ;;  %83 = vperm.xlu1 %1083, %v16_v20  }
  0x2a   :  { %135 = vperm.xlu0 %1082, %v24_v21   ;;  %205 = vperm.xlu1 %1083, %v34_v22  }
  0x2e   :  { %200 = vperm.xlu0 %1082, %v33_v23   ;;  %195 = vperm.xlu1 %1083, %v32_v24  }
  0x32   :  { %306 = vperm.xlu0 %1082, %v43_v25   ;;  %326 = vperm.xlu1 %1083, %v47_v26  }
  0x36   :  { %301 = vperm.xlu0 %1082, %v42_v27   ;;  %321 = vperm.xlu1 %1083, %v46_v28  }
  0x3a   :  { %296 = vperm.xlu0 %1082, %v41_v29   ;;  %316 = vperm.xlu1 %1083, %v45_v30  }
  0x3e   :  { %291 = vperm.xlu0 %1082, %v40_v31   ;;  %311 = vperm.xlu1 %1083, %v44_v32  }
  0x42   :  { %488 = vperm.xlu0 %1082, %v51_v33   ;;  %483 = vperm.xlu1 %1083, %v50_v34  }
  0x46   :  { %478 = vperm.xlu0 %1082, %v49_v35   ;;  %473 = vperm.xlu1 %1083, %v48_v36  }
  0x4a   :  { %610 = vperm.xlu0 %1082, %v55_v37   ;;  %605 = vperm.xlu1 %1083, %v54_v38  }
  0x4e   :  { %600 = vperm.xlu0 %1082, %v53_v39   ;;  %595 = vperm.xlu1 %1083, %v52_v40  }
  0x52   :  { %731 = vperm.xlu0 %1082, %v59_v41   ;;  %726 = vperm.xlu1 %1083, %v58_v42  }
  0x56   :  { %721 = vperm.xlu0 %1082, %v57_v44   ;;  %716 = vperm.xlu1 %1083, %v56_v45  }
  0x7d   :  { %v119_v49 = vpop.permute.xlu0 %118  ;;  %v114_v50 = vpop.permute.xlu1 %113 }
  0x7e   :  { %v132_v60 = vmul.f32 %v124_v56, %v119_v49  ;;  %v131_v1 = vmul.f32 %v124_v56, %v114_v50 }
  0x81   :  { %v171_v54 = vpop.permute.xlu0 %170  ;;  %v166_v55 = vpop.permute.xlu1 %165 }
  0x82   :  { %v184_v57 = vmul.f32 %v1301_v53, %v171_v54  ;;  %v183_v61 = vmul.f32 %v1301_v53, %v166_v55 }
  0x84   :  { %v192_v62 = vadd.f32 %v184_v57, %v132_v60  ;;  %v191_v4 = vadd.f32 %v183_v61, %v131_v1 }
  0x85   :  { %v161_v58 = vpop.permute.xlu1 %160  ;;  %v109_v59 = vpop.permute.xlu0 %108 }
  0x86   :  { %v182_v8 = vmul.f32 %v1301_v53, %v161_v58  ;;  %v130_v9 = vmul.f32 %v124_v56, %v109_v59 }
  0x88   :  { %v190_v14 = vadd.f32 %v182_v8, %v130_v9 }
  0x89   :  { %v231_v63 = vpop.permute.xlu0 %230  ;;  %v104_v0 = vpop.permute.xlu1 %103 }
  0x8a   :  { %v240_v2 = vadd.f32 %v231_v63, %v192_v62  ;;  %v129_v17 = vmul.f32 %v124_v56, %v104_v0 }
  0x8c   :  { %v930_v3 = vmul.f32 -1.442695, %v240_v2 }
  0x8d   :  { %v156_v5 = vpop.permute.xlu0 %155  ;;  %v226_v6 = vpop.permute.xlu1 %225 }
  0x8e   :  { %1084 = vpow2.f32 %v930_v3  ;;  %v239_v7 = vadd.f32 %v226_v6, %v191_v4  ;;  %v181_v13 = vmul.f32 %v1301_v53, %v156_v5 }
  0x90   :  { %v929_v10 = vmul.f32 -1.442695, %v239_v7  ;;  %v189_v20 = vadd.f32 %v181_v13, %v129_v17  ;;  %v61_v13 = vld [vmem:[%s1396_s2 + $0x8] sm:$0xff] }
  0x91   :  { %v151_v11 = vpop.permute.xlu1 %150  ;;  %v99_v12 = vpop.permute.xlu0 %98  ;;  %v65_v17 = vld [vmem:[%s1396_s2 + $0x28] sm:$0xff] }
  0x92   :  { %1086 = vpow2.f32 %v929_v10  ;;  %v180_v26 = vmul.f32 %v1301_v53, %v151_v11  ;;  %v128_v27 = vmul.f32 %v124_v56, %v99_v12 }
  0x94   :  { %v188_v34 = vadd.f32 %v180_v26, %v128_v27 }
  0x95   :  { %v221_v15 = vpop.permute.xlu0 %220  ;;  %v94_v16 = vpop.permute.xlu1 %93 }
  0x96   :  { %v238_v18 = vadd.f32 %v221_v15, %v190_v14  ;;  %v127_v37 = vmul.f32 %v124_v56, %v94_v16  ;;  %v62_v14 = vld [vmem:[%s1396_s2 + $0x10] sm:$0xff]  ;;  %v63_v15 = vld [vmem:[%s1396_s2 + $0x18] sm:$0xff]  ;;  %v64_v16 = vld [vmem:[%s1396_s2 + $0x20] sm:$0xff] }
  0x98   :  { %v928_v19 = vmul.f32 -1.442695, %v238_v18  ;;  %v66_v18 = vld [vmem:[%s1396_s2 + $0x30] sm:$0xff] }
  0x99   :  { %v146_v21 = vpop.permute.xlu0 %145  ;;  %v216_v22 = vpop.permute.xlu1 %215 }
  0x9a   :  { %1088 = vpow2.f32 %v928_v19  ;;  %v237_v23 = vadd.f32 %v216_v22, %v189_v20  ;;  %v179_v33 = vmul.f32 %v1301_v53, %v146_v21  ;;  %v67_v19 = vld [vmem:[%s1396_s2 + $0x38] sm:$0xff]  ;;  %v68_v20 = vld [vmem:[%s1396_s2 + $0x40] sm:$0xff] }
  0x9b   :  { %v1085_v24 = vpop.eup %1084  ;;  %1033 = vmatprep.mubr.msk.f32.mxu1 %vm491_vm1, %v68_v20 }
  0x9c   :  { %v272_v25 = vadd.f32 1.0, %v1085_v24  ;;  %v927_v28 = vmul.f32 -1.442695, %v237_v23  ;;  %v187_v42 = vadd.f32 %v179_v33, %v127_v37 }
  0x9d   :  { %v141_v29 = vpop.permute.xlu1 %140  ;;  %v89_v30 = vpop.permute.xlu0 %88 }
  0x9e   :  { %1090 = vrcp.f32 %v272_v25  ;;  %v178_v39 = vmul.f32 %v1301_v53, %v141_v29  ;;  %v126_v40 = vmul.f32 %v124_v56, %v89_v30 }
  0x9f   :  { %v1087_v31 = vpop.eup %1086  ;;  %1092 = vpow2.f32 %v927_v28 }
  0xa0   :  { %v271_v32 = vadd.f32 1.0, %v1087_v31  ;;  %v186_v51 = vadd.f32 %v178_v39, %v126_v40 }
  0xa1   :  { %v211_v35 = vpop.permute.xlu0 %210  ;;  %v84_v36 = vpop.permute.xlu1 %83 }
  0xa2   :  { %1094 = vrcp.f32 %v271_v32  ;;  %v236_v38 = vadd.f32 %v211_v35, %v188_v34  ;;  %v125_v45 = vmul.f32 %v124_v56, %v84_v36 }
  0xa4   :  { %v926_v41 = vmul.f32 -1.442695, %v236_v38 }
  0xa5   :  { %v136_v43 = vpop.permute.xlu0 %135  ;;  %v206_v44 = vpop.permute.xlu1 %205 }
  0xa6   :  { %1096 = vpow2.f32 %v926_v41  ;;  %v177_v46 = vmul.f32 %v1301_v53, %v136_v43  ;;  %v235_v47 = vadd.f32 %v206_v44, %v187_v42 }
  0xa7   :  { %v1089_v48 = vpop.eup %1088 }
  0xa8   :  { %v270_v49 = vadd.f32 1.0, %v1089_v48  ;;  %v925_v50 = vmul.f32 -1.442695, %v235_v47  ;;  %v185_v52 = vadd.f32 %v177_v46, %v125_v45 }
  0xa9   :  { %v201_v54 = vpop.permute.xlu0 %200  ;;  %v196_v55 = vpop.permute.xlu1 %195 }
  0xaa   :  { %1098 = vrcp.f32 %v270_v49  ;;  %v234_v57 = vadd.f32 %v201_v54, %v186_v51  ;;  %v233_v58 = vadd.f32 %v196_v55, %v185_v52 }
  0xab   :  { %v1091_v59 = vpop.eup %1090  ;;  %1100 = vpow2.f32 %v925_v50 }
  0xac   :  { %v1093_v60 = vpop.eup %1092  ;;  %v924_v61 = vmul.f32 -1.442695, %v234_v57  ;;  %v923_v62 = vmul.f32 -1.442695, %v233_v58  ;;  %997 = vmatprep.subr.mxu0 %v1091_v59 }
  0xad   :  { %v269_v56 = vadd.f32 1.0, %v1093_v60  ;;  %998 = vmatpush3.msra.mxu0 %v1091_v59  ;;  %v327_v21 = vpop.permute.xlu1 %326  ;;  %v307_v22 = vpop.permute.xlu0 %306  ;;  %v69_v59 = vld [vmem:[%s1396_s2 + $0x48] sm:$0xff]  ;;  %v70_v60 = vld [vmem:[%s1396_s2 + $0x50] sm:$0xff] }
  0xae   :  { %1102 = vpow2.f32 %v924_v61  ;;  %v71_v61 = vld [vmem:[%s1396_s2 + $0x58] sm:$0xff] }
  0xaf   :  { %v1095_v53 = vpop.eup %1094  ;;  %1104 = vrcp.f32 %v269_v56 }
  0xb0   :  { %1106 = vpow2.f32 %v923_v62  ;;  %999 = vmatprep.subr.mxu0 %v1095_v53  ;;  %v72_v62 = vld [vmem:[%s1396_s2 + $0x60] sm:$0xff] }
  0xb1   :  { %1000 = vmatpush3.msra.mxu0 %v1095_v53  ;;  %v322_v24 = vpop.permute.xlu1 %321  ;;  %v302_v26 = vpop.permute.xlu0 %301 }
  0xb3   :  { %v1097_v63 = vpop.eup %1096 }
  0xb4   :  { %v268_v0 = vadd.f32 1.0, %v1097_v63 }
  0xb5   :  { %v317_v29 = vpop.permute.xlu1 %316  ;;  %v297_v31 = vpop.permute.xlu0 %296 }
  0xb6   :  { %1108 = vrcp.f32 %v268_v0 }
  0xb7   :  { %v1099_v1 = vpop.eup %1098 }
  0xb8   :  { %v1101_v2 = vpop.eup %1100  ;;  %1001 = vmatprep.subr.mxu0 %v1099_v1 }
  0xb9   :  { %v267_v3 = vadd.f32 1.0, %v1101_v2  ;;  %1002 = vmatpush3.msra.mxu0 %v1099_v1  ;;  %v312_v38 = vpop.permute.xlu1 %311  ;;  %v292_v41 = vpop.permute.xlu0 %291 }
  0xbb   :  { %v1103_v4 = vpop.eup %1102  ;;  %1110 = vrcp.f32 %v267_v3 }
  0xbc   :  { %v1105_v5 = vpop.eup %1104  ;;  %v266_v6 = vadd.f32 1.0, %v1103_v4 }
  0xbd   :  { %v1107_v7 = vpop.eup %1106  ;;  %1003 = vmatprep.subr.mxu0 %v1105_v5  ;;  %v489_v56 = vpop.permute.xlu0 %488 }
  0xbe   :  { %1112 = vrcp.f32 %v266_v6  ;;  %v265_v8 = vadd.f32 1.0, %v1107_v7  ;;  %1004 = vmatpush3.msra.mxu0 %v1105_v5  ;;  %v484_v63 = vpop.permute.xlu1 %483 }
  0xc0   :  { %1114 = vrcp.f32 %v265_v8 }
  0xc1   :  { %v479_v3 = vpop.permute.xlu0 %478 }
  0xc2   :  { %v474_v8 = vpop.permute.xlu1 %473 }
  0xc3   :  { %v1109_v9 = vpop.eup %1108 }
  0xc4   :  { %1005 = vmatprep.subr.mxu0 %v1109_v9 }
  0xc5   :  { %1006 = vmatpush3.msra.mxu0 %v1109_v9 }
  0xc8   :  { %v1111_v10 = vpop.eup %1110 }
  0xc9   :  { %1007 = vmatprep.subr.mxu0 %v1111_v10 }
  0xca   :  { %1008 = vmatpush3.msra.mxu0 %v1111_v10 }
  0xcb   :  { %v1113_v11 = vpop.eup %1112 }
  0xcc   :  { %1009 = vmatprep.subr.mxu0 %v1113_v11 }
  0xcd   :  { %v1115_v12 = vpop.eup %1114  ;;  %1010 = vmatpush3.msra.mxu0 %v1113_v11 }
  0xce   :  { %1011 = vmatprep.subr.mxu0 %v1115_v12 }
  0xcf   :  { %1012 = vmatpush3.msra.mxu0 %v1115_v12 }
  0xd0   :  { %1014 = vmatmul.mubr.msk.f32.vlgmr.msra.gmra.mxu0 %vm329_vm0, %v61_v13  ;;  %v73_v13 = vld [vmem:[%s1396_s2 + $0x68] sm:$0xff] }
  0xd1   :  { %1016 = vmatprep.mubr.msk.f32.mxu0 %vm329_vm0, %v62_v14  ;;  %v74_v14 = vld [vmem:[%s1396_s2 + $0x70] sm:$0xff] }
  0xd4   :  { %1017 = vmatmul.mubr.msk.f32.gmra.mxu0 %vm329_vm0, %v63_v15  ;;  %v75_v15 = vld [vmem:[%s1396_s2 + $0x78] sm:$0xff] }
  0xd5   :  { %1019 = vmatprep.mubr.msk.f32.mxu0 %vm329_vm0, %v64_v16  ;;  %v76_v16 = vld [vmem:[%s1396_s2 + $0x80] sm:$0xff] }
  0xd8   :  { %1020 = vmatmul.mubr.msk.f32.gmra.mxu0 %vm329_vm0, %v65_v17  ;;  %v611_v17 = vpop.permute.xlu0 %610 }
  0xd9   :  { %1022 = vmatprep.mubr.msk.f32.mxu0 %vm329_vm0, %v66_v18 }
  0xdc   :  { %1023 = vmatmul.mubr.msk.f32.gmra.mxu0 %vm329_vm0, %v67_v19  ;;  %v606_v19 = vpop.permute.xlu1 %605 }
 0x190   :  { %v1015_v23 = vpop.f32.mrf.mxu0 }
 0x191   :  { %v426_v39 = vadd.f32 %v1015_v23, %v297_v31  ;;  %v601_v23 = vpop.permute.xlu0 %600 }
 0x192   :  { %v420_v25 = vpop.f32.mrf.mxu0 }
 0x193   :  { %v421_v46 = vadd.f32 %v420_v25, %v292_v41  ;;  %v460_v51 = vmax.f32 %v426_v39, 0.0 }
 0x194   :  { %v1018_v27 = vpop.f32.mrf.mxu0 }
 0x195   :  { %v436_v33 = vadd.f32 %v1018_v27, %v307_v22  ;;  %v459_v55 = vmax.f32 %v421_v46, 0.0 }
 0x196   :  { %v430_v28 = vpop.f32.mrf.mxu0 }
 0x197   :  { %v431_v35 = vadd.f32 %v430_v28, %v302_v26  ;;  %v462_v42 = vmax.f32 %v436_v33, 0.0  ;;  %v596_v28 = vpop.permute.xlu1 %595  ;;  %v77_v33 = vld [vmem:[%s1396_s2 + $0x88] sm:$0xff] }
 0x198   :  { %v1021_v30 = vpop.f32.mrf.mxu0 }
 0x199   :  { %v446_v36 = vadd.f32 %v1021_v30, %v317_v29  ;;  %v461_v47 = vmax.f32 %v431_v35, 0.0  ;;  %v79_v35 = vld [vmem:[%s1396_s2 + $0x98] sm:$0xff] }
 0x19a   :  { %v440_v32 = vpop.f32.mrf.mxu0 }
 0x19b   :  { %v441_v43 = vadd.f32 %v440_v32, %v312_v38  ;;  %v464_v48 = vmax.f32 %v446_v36, 0.0  ;;  %v1139_v36 = vmov 0.0   ;;  %v727_v39 = vpop.permute.xlu1 %726 }
 0x19c   :  { %v1024_v34 = vpop.f32.mrf.mxu0  ;;  %1067 = vmatprep.subr.mxu0 %v1139_v36  ;;  %1075 = vmatprep.mubr.msk.f32.mxu0 %vm1140_vm2, %v1139_v36 }
 0x19d   :  { %v456_v37 = vadd.f32 %v1024_v34, %v327_v21  ;;  %v463_v52 = vmax.f32 %v441_v43, 0.0  ;;  %v468_v57 = vmul.f32 %v464_v48, %v460_v51  ;;  %v78_v34 = vld [vmem:[%s1396_s2 + $0x90] sm:$0xff] }
 0x19e   :  { %v450_v40 = vpop.f32.mrf.mxu0 }
 0x19f   :  { %v466_v44 = vmax.f32 %v456_v37, 0.0  ;;  %v451_v45 = vadd.f32 %v450_v40, %v322_v24  ;;  %v467_v58 = vmul.f32 %v463_v52, %v459_v55  ;;  %v732_v37 = vpop.permute.xlu0 %731  ;;  %v717_v48 = vpop.permute.xlu1 %716 }
 0x1a1   :  { %v465_v49 = vmax.f32 %v451_v45, 0.0  ;;  %v470_v50 = vmul.f32 %v466_v44, %v462_v42 }
 0x1a3   :  { %v469_v54 = vmul.f32 %v465_v49, %v461_v47  ;;  %1025 = vmatprep.subr.mxu1 %v470_v50  ;;  %v722_v43 = vpop.permute.xlu0 %721 }
 0x1a4   :  { %1026 = vmatpush3.msra.mxu1 %v470_v50 }
 0x1a5   :  { %1027 = vmatprep.subr.mxu1 %v469_v54 }
 0x1a6   :  { %1028 = vmatpush3.msra.mxu1 %v469_v54  ;;  %v80_v54 = vld [vmem:[%s1396_s2 + $0xa0] sm:$0x1] }
 0x1a7   :  { %1029 = vmatprep.subr.mxu1 %v468_v57 }
 0x1a8   :  { %1030 = vmatpush3.msra.mxu1 %v468_v57 }
 0x1a9   :  { %1031 = vmatprep.subr.mxu1 %v467_v58 }
 0x1aa   :  { %1032 = vmatpush3.msra.mxu1 %v467_v58 }
 0x1ab   :  { %1034 = vmatmul.mubr.msk.f32.vlgmr.msra.gmra.mxu1 %vm491_vm1, %v69_v59 }
 0x1ac   :  { %1036 = vmatprep.mubr.msk.f32.mxu1 %vm491_vm1, %v70_v60 }
 0x1af   :  { %1037 = vmatmul.mubr.msk.f32.gmra.mxu1 %vm491_vm1, %v71_v61 }
 0x1b0   :  { %1047 = vmatprep.mubr.msk.f32.mxu1 %vm491_vm1, %v72_v62 }
 0x26b   :  { %v1035_v53 = vpop.f32.mrf.mxu1 }
 0x26c   :  { %v576_v5 = vadd.f32 %v1035_v53, %v479_v3 }
 0x26d   :  { %v570_v0 = vpop.f32.mrf.mxu1 }
 0x26e   :  { %v571_v9 = vadd.f32 %v570_v0, %v474_v8  ;;  %v590_v11 = vmax.f32 %v576_v5, 0.0 }
 0x26f   :  { %v1038_v1 = vpop.f32.mrf.mxu1 }
 0x270   :  { %v586_v2 = vadd.f32 %v1038_v1, %v489_v56  ;;  %v589_v12 = vmax.f32 %v571_v9, 0.0 }
 0x271   :  { %v580_v4 = vpop.f32.mrf.mxu1 }
 0x272   :  { %v592_v6 = vmax.f32 %v586_v2, 0.0  ;;  %v581_v7 = vadd.f32 %v580_v4, %v484_v63 }
 0x274   :  { %v591_v10 = vmax.f32 %v581_v7, 0.0  ;;  %1039 = vmatprep.subr.mxu1 %v592_v6 }
 0x275   :  { %1040 = vmatpush3.msra.mxu1 %v592_v6 }
 0x276   :  { %1041 = vmatprep.subr.mxu1 %v591_v10 }
 0x277   :  { %1042 = vmatpush3.msra.mxu1 %v591_v10 }
 0x278   :  { %1043 = vmatprep.subr.mxu1 %v590_v11 }
 0x279   :  { %1044 = vmatpush3.msra.mxu1 %v590_v11 }
 0x27a   :  { %1045 = vmatprep.subr.mxu1 %v589_v12 }
 0x27b   :  { %1046 = vmatpush3.msra.mxu1 %v589_v12 }
 0x27c   :  { %1048 = vmatmul.mubr.msk.f32.vlgmr.msra.gmra.mxu1 %vm491_vm1, %v73_v13 }
 0x27d   :  { %1050 = vmatprep.mubr.msk.f32.mxu1 %vm491_vm1, %v74_v14 }
 0x280   :  { %1051 = vmatmul.mubr.msk.f32.gmra.mxu1 %vm491_vm1, %v75_v15 }
 0x281   :  { %1061 = vmatprep.mubr.msk.f32.mxu1 %vm491_vm1, %v76_v16 }
 0x33c   :  { %v1049_v18 = vpop.f32.mrf.mxu1 }
 0x33d   :  { %v697_v25 = vadd.f32 %v1049_v18, %v601_v23 }
 0x33e   :  { %v691_v20 = vpop.f32.mrf.mxu1 }
 0x33f   :  { %v692_v29 = vadd.f32 %v691_v20, %v596_v28  ;;  %v711_v31 = vmax.f32 %v697_v25, 0.0 }
 0x340   :  { %v1052_v21 = vpop.f32.mrf.mxu1 }
 0x341   :  { %v707_v22 = vadd.f32 %v1052_v21, %v611_v17  ;;  %v710_v32 = vmax.f32 %v692_v29, 0.0 }
 0x342   :  { %v701_v24 = vpop.f32.mrf.mxu1 }
 0x343   :  { %v713_v26 = vmax.f32 %v707_v22, 0.0  ;;  %v702_v27 = vadd.f32 %v701_v24, %v606_v19 }
 0x345   :  { %v712_v30 = vmax.f32 %v702_v27, 0.0  ;;  %1053 = vmatprep.subr.mxu1 %v713_v26 }
 0x346   :  { %1054 = vmatpush3.msra.mxu1 %v713_v26 }
 0x347   :  { %1055 = vmatprep.subr.mxu1 %v712_v30 }
 0x348   :  { %1056 = vmatpush3.msra.mxu1 %v712_v30 }
 0x349   :  { %1057 = vmatprep.subr.mxu1 %v711_v31 }
 0x34a   :  { %1058 = vmatpush3.msra.mxu1 %v711_v31 }
 0x34b   :  { %1059 = vmatprep.subr.mxu1 %v710_v32 }
 0x34c   :  { %1060 = vmatpush3.msra.mxu1 %v710_v32 }
 0x34d   :  { %1062 = vmatmul.mubr.msk.f32.vlgmr.msra.gmra.mxu1 %vm491_vm1, %v77_v33 }
 0x34e   :  { %1064 = vmatprep.mubr.msk.f32.mxu1 %vm491_vm1, %v78_v34 }
 0x351   :  { %1065 = vmatmul.mubr.msk.f32.gmra.mxu1 %vm491_vm1, %v79_v35 }
 0x40d   :  { %v1063_v38 = vpop.f32.mrf.mxu1 }
 0x40e   :  { %v818_v45 = vadd.f32 %v1063_v38, %v722_v43 }
 0x40f   :  { %v812_v40 = vpop.f32.mrf.mxu1 }
 0x410   :  { %v813_v49 = vadd.f32 %v812_v40, %v717_v48  ;;  %v832_v51 = vmax.f32 %v818_v45, 0.0 }
 0x411   :  { %v1066_v41 = vpop.f32.mrf.mxu1 }
 0x412   :  { %v828_v42 = vadd.f32 %v1066_v41, %v732_v37  ;;  %v831_v52 = vmax.f32 %v813_v49, 0.0 }
 0x413   :  { %v822_v44 = vpop.f32.mrf.mxu1 }
 0x414   :  { %v834_v46 = vmax.f32 %v828_v42, 0.0  ;;  %v823_v47 = vadd.f32 %v822_v44, %v727_v39 }
 0x416   :  { %v833_v50 = vmax.f32 %v823_v47, 0.0  ;;  %1068 = vmatpush3.msra.mxu0 %v834_v46 }
 0x417   :  { %1069 = vmatprep.subr.mxu0 %v1139_v36 }
 0x418   :  { %1070 = vmatpush3.msra.mxu0 %v833_v50 }
 0x419   :  { %1071 = vmatprep.subr.mxu0 %v1139_v36 }
 0x41a   :  { %1072 = vmatpush3.msra.mxu0 %v832_v51 }
 0x41b   :  { %1073 = vmatprep.subr.mxu0 %v1139_v36 }
 0x41c   :  { %1074 = vmatpush3.msra.mxu0 %v831_v52 }
 0x41d   :  { %1076 = vmatmul.mubr.msk.f32.vlgmr.msra.gmra.mxu0 %vm491_vm1, %v80_v54 }
 0x4dd   :  { %v904_v55 = vpop.f32.mrf.mxu0 }
 0x4de   :  { %908 = vst [vmem:[#allocation2] sm:$0x1] %v904_v55 }
 0x4df   :  { %v1077_v57 = vpop.f32.mrf.mxu0 }
 0x4e0   :  { %1127 = shalt.err (!%p1124_p4)
}
 0x4e1   :  { %918 = dma.vmem_to_hbm [thread:$0]  %s916_s6, 16, %s1397_s3, [#allocation3]  }
 0x4e2   :  { %1136 = dma.done.wait [#allocation3], 16  }
 0x4e3   :  { %1137 = vsyncadd [#allocation3], 4294967280 }
 0x4e4   :  { %922 = vsyncpa [#allocation3], 1 }

</bundles_post_ra>
